<compile_context>
chip_gen: v7x
topology: tpu7x:2x2x1
jax: 0.10.0
libtpu: 0.0.40
codegen_flags: <defaults>
</compile_context>

<pallas_src>
import functools

import jax
import jax.numpy as jnp
from jax.experimental import pallas as pl
from jax.experimental.pallas import tpu as pltpu

_INV_SQRT2 = 0.7071067811865476


def _dab_kernel(x_ref, w1t_ref, b1_ref, w2t_ref, b2_ref, o_ref, *, num_layers):
    # x_ref block: (Nb, C, HW) float32, HW on lanes.
    x = x_ref[...]
    hw = x.shape[-1]

    # Single spatial mean (GAP) for the whole layer stack.
    gap = jnp.sum(x, axis=-1) * (1.0 / hw)          # (Nb, C)
    gate = jnp.ones_like(gap)                       # running prod of per-layer gates

    for l in range(num_layers):
        # conv1 (1x1): C -> C//2, exact (erf) GELU as in torch nn.GELU default.
        h = jnp.dot(gap, w1t_ref[l], preferred_element_type=jnp.float32) + b1_ref[l][None, :]
        h = 0.5 * h * (1.0 + jax.lax.erf(h * _INV_SQRT2))
        # conv2 (1x1): C//2 -> C, sigmoid gate.
        a = jnp.dot(h, w2t_ref[l], preferred_element_type=jnp.float32) + b2_ref[l][None, :]
        a = jax.nn.sigmoid(a)                       # (Nb, C)

        gate = gate * a
        if l + 1 < num_layers:
            # mean(x_l * a_l) == a_l * mean(x_l): carry the gap analytically.
            gap = gap * a

    # One broadcast multiply over the spatial (lane) axis.
    o_ref[...] = x * gate[:, :, None]


def _pick_batch_block(n, c, hw, itemsize=4, target_bytes=4 << 20):
    """Largest divisor of n whose (nb, C, HW) tile stays under target_bytes."""
    per_elem = c * hw * itemsize
    best = 1
    for nb in range(1, n + 1):
        if n % nb == 0 and nb * per_elem <= target_bytes:
            best = nb
    return best


def dab_forward(x_nchw, w1, b1, w2, b2):
    """x_nchw: (N, C, H, W) float32.
       Stacked 1x1-conv weights: w1 (L, C//2, C), b1 (L, C//2),
                                 w2 (L, C, C//2), b2 (L, C)."""
    N, C, H, W = x_nchw.shape
    L = w1.shape[0]
    HW = H * W
    Ch = C // 2

    # Free layout change: NCHW -> (N, C, HW). No transpose, just a reshape.
    x = x_nchw.reshape(N, C, HW)

    # One-time weight transposes in the wrapper (tiny), so the kernel never
    # transposes per layer.
    w1t = jnp.transpose(w1, (0, 2, 1))   # (L, C,  C//2)
    w2t = jnp.transpose(w2, (0, 2, 1))   # (L, C//2, C)

    Nb = _pick_batch_block(N, C, HW)
    grid = (N // Nb,)

    kernel = functools.partial(_dab_kernel, num_layers=L)
    out = pl.pallas_call(
        kernel,
        out_shape=jax.ShapeDtypeStruct((N, C, HW), jnp.float32),
        grid_spec=pltpu.PrefetchScalarGridSpec(
            num_scalar_prefetch=0,
            grid=grid,
            in_specs=[
                pl.BlockSpec((Nb, C, HW), lambda n: (n, 0, 0)),
                pl.BlockSpec((L, C, Ch), lambda n: (0, 0, 0)),
                pl.BlockSpec((L, Ch), lambda n: (0, 0)),
                pl.BlockSpec((L, Ch, C), lambda n: (0, 0, 0)),
                pl.BlockSpec((L, C), lambda n: (0, 0)),
            ],
            out_specs=pl.BlockSpec((Nb, C, HW), lambda n: (n, 0, 0)),
        ),
        compiler_params=pltpu.CompilerParams(
            dimension_semantics=("parallel",),
        ),
        # TODO(synk): for very large HW on v7x, split the spatial axis into a
        # GAP-accumulate pass + scale pass (enabled by the gate fold) so both
        # TensorCores get work when N is 1-2 and tiles fit the 64 MiB VMEM.
    )(x, w1t, b1, w2t, b2)

    return out.reshape(N, C, H, W)


def dab_reference(x_nchw, w1, b1, w2, b2):
    """Pure-JAX reference mirroring the PyTorch module (per-layer GAP)."""
    x = x_nchw
    L = w1.shape[0]
    for l in range(L):
        gap = jnp.mean(x, axis=(2, 3), keepdims=True)                       # (N, C, 1, 1)
        h = jnp.einsum("ncij,oc->noij", gap, w1[l]) + b1[l][None, :, None, None]
        h = 0.5 * h * (1.0 + jax.lax.erf(h / jnp.sqrt(2.0)))
        a = jnp.einsum("ncij,oc->noij", h, w2[l]) + b2[l][None, :, None, None]
        a = jax.nn.sigmoid(a)
        x = x * a
    return x


if __name__ == "__main__":
    # Shapes consistent with DAB(embed_dim=8, dab_layers=2) on (2, 8, 16, 16).
    N, C, H, W = 2, 8, 16, 16
    L = 2

    key = jax.random.PRNGKey(0)
    kx, k1, k2, k3, k4 = jax.random.split(key, 5)
    x = jax.random.normal(kx, (N, C, H, W), dtype=jnp.float32)
    # Deterministic synthetic 1x1-conv weights (as dense matrices).
    w1 = 0.1 * jax.random.normal(k1, (L, C // 2, C), dtype=jnp.float32)
    b1 = 0.1 * jax.random.normal(k2, (L, C // 2), dtype=jnp.float32)
    w2 = 0.1 * jax.random.normal(k3, (L, C, C // 2), dtype=jnp.float32)
    b2 = 0.1 * jax.random.normal(k4, (L, C), dtype=jnp.float32)

    out = jax.block_until_ready(dab_forward(x, w1, b1, w2, b2))
    ref = jax.block_until_ready(dab_reference(x, w1, b1, w2, b2))

    assert out.shape == (N, C, H, W)
    # Gate folding only reassociates the spatial mean; stays well within tol.
    assert jnp.allclose(out, ref, atol=1e-5, rtol=1e-4), "mismatch vs reference"
    print("KERNEL_OK")
</pallas_src>

<mosaic_0001>
module attributes {stable_mosaic.version = 11 : i64} {
  func.func @_dab_kernel(%arg0: i32, %arg1: memref<2x8x256xf32, #tpu.memory_space<vmem>>, %arg2: memref<2x8x4xf32, #tpu.memory_space<vmem>>, %arg3: memref<2x4xf32, #tpu.memory_space<vmem>>, %arg4: memref<2x4x8xf32, #tpu.memory_space<vmem>>, %arg5: memref<2x8xf32, #tpu.memory_space<vmem>>, %arg6: memref<2x8x256xf32, #tpu.memory_space<vmem>>) attributes {dimension_semantics = [#tpu.dimension_semantics<parallel>], iteration_bounds = array<i64: 1>, scalar_prefetch = 0 : i64, scratch_operands = 0 : i64, tpu.core_type = #tpu.core_type<tc>, window_params = [{transform_indices = @transform_0, window_bounds = array<i64: 2, 8, 256>}, {pipeline_mode = #tpu.pipeline_mode<synchronous>, transform_indices = @transform_1, window_bounds = array<i64: 2, 8, 4>}, {pipeline_mode = #tpu.pipeline_mode<synchronous>, transform_indices = @transform_2, window_bounds = array<i64: 2, 4>}, {pipeline_mode = #tpu.pipeline_mode<synchronous>, transform_indices = @transform_3, window_bounds = array<i64: 2, 4, 8>}, {pipeline_mode = #tpu.pipeline_mode<synchronous>, transform_indices = @transform_4, window_bounds = array<i64: 2, 8>}, {transform_indices = @transform_5, window_bounds = array<i64: 2, 8, 256>}]} {
    %c0 = arith.constant 0 : index
    %c0_0 = arith.constant 0 : index
    %c0_1 = arith.constant 0 : index
    %0 = vector.load %arg1[%c0, %c0_0, %c0_1] : memref<2x8x256xf32, #tpu.memory_space<vmem>>, vector<2x8x256xf32>
    %cst = arith.constant dense<0.000000e+00> : vector<2x8xf32>
    %1 = vector.multi_reduction <add>, %0, %cst [2] : vector<2x8x256xf32> to vector<2x8xf32>
    %cst_2 = arith.constant 3.906250e-03 : f32
    %2 = vector.broadcast %cst_2 : f32 to vector<2x8xf32>
    %3 = arith.mulf %1, %2 : vector<2x8xf32>
    %cst_3 = arith.constant 1.000000e+00 : f32
    %4 = vector.broadcast %cst_3 : f32 to vector<2x8xf32>
    %c0_4 = arith.constant 0 : index
    %c0_5 = arith.constant 0 : index
    %c0_6 = arith.constant 0 : index
    %5 = vector.load %arg2[%c0_4, %c0_5, %c0_6] : memref<2x8x4xf32, #tpu.memory_space<vmem>>, vector<1x8x4xf32>
    %6 = vector.shape_cast %5 : vector<1x8x4xf32> to vector<8x4xf32>
    %cst_7 = arith.constant dense<0.000000e+00> : vector<2x4xf32>
    %7 = tpu.matmul %3, %6, %cst_7 {dimension_numbers = #tpu.dot_dimension_numbers<[1], [0], [0], [1], [0, 0, 1, 1], [], []>} : vector<2x8xf32>, vector<8x4xf32>, vector<2x4xf32> -> vector<2x4xf32>
    %c0_8 = arith.constant 0 : index
    %c0_9 = arith.constant 0 : index
    %8 = vector.load %arg3[%c0_8, %c0_9] : memref<2x4xf32, #tpu.memory_space<vmem>>, vector<1x4xf32>
    %9 = vector.shape_cast %8 : vector<1x4xf32> to vector<4xf32>
    %10 = vector.shape_cast %9 : vector<4xf32> to vector<1x4xf32>
    %11 = vector.broadcast %10 : vector<1x4xf32> to vector<2x4xf32>
    %12 = arith.addf %7, %11 : vector<2x4xf32>
    %cst_10 = arith.constant 5.000000e-01 : f32
    %13 = vector.broadcast %cst_10 : f32 to vector<2x4xf32>
    %14 = arith.mulf %13, %12 : vector<2x4xf32>
    %cst_11 = arith.constant 0.707106769 : f32
    %15 = vector.broadcast %cst_11 : f32 to vector<2x4xf32>
    %16 = arith.mulf %12, %15 : vector<2x4xf32>
    %17 = math.erf %16 : vector<2x4xf32>
    %cst_12 = arith.constant 1.000000e+00 : f32
    %18 = vector.broadcast %cst_12 : f32 to vector<2x4xf32>
    %19 = arith.addf %18, %17 : vector<2x4xf32>
    %20 = arith.mulf %14, %19 : vector<2x4xf32>
    %c0_13 = arith.constant 0 : index
    %c0_14 = arith.constant 0 : index
    %c0_15 = arith.constant 0 : index
    %21 = vector.load %arg4[%c0_13, %c0_14, %c0_15] : memref<2x4x8xf32, #tpu.memory_space<vmem>>, vector<1x4x8xf32>
    %22 = vector.shape_cast %21 : vector<1x4x8xf32> to vector<4x8xf32>
    %cst_16 = arith.constant dense<0.000000e+00> : vector<2x8xf32>
    %23 = tpu.matmul %20, %22, %cst_16 {dimension_numbers = #tpu.dot_dimension_numbers<[1], [0], [0], [1], [0, 0, 1, 1], [], []>} : vector<2x4xf32>, vector<4x8xf32>, vector<2x8xf32> -> vector<2x8xf32>
    %c0_17 = arith.constant 0 : index
    %c0_18 = arith.constant 0 : index
    %24 = vector.load %arg5[%c0_17, %c0_18] : memref<2x8xf32, #tpu.memory_space<vmem>>, vector<1x8xf32>
    %25 = vector.shape_cast %24 : vector<1x8xf32> to vector<8xf32>
    %26 = vector.shape_cast %25 : vector<8xf32> to vector<1x8xf32>
    %27 = vector.broadcast %26 : vector<1x8xf32> to vector<2x8xf32>
    %28 = arith.addf %23, %27 : vector<2x8xf32>
    %29 = arith.negf %28 : vector<2x8xf32>
    %30 = math.exp %29 : vector<2x8xf32>
    %cst_19 = arith.constant 1.000000e+00 : f32
    %31 = vector.broadcast %cst_19 : f32 to vector<2x8xf32>
    %32 = arith.addf %31, %30 : vector<2x8xf32>
    %33 = arith.divf %31, %32 : vector<2x8xf32>
    %34 = arith.mulf %4, %33 : vector<2x8xf32>
    %35 = arith.mulf %3, %33 : vector<2x8xf32>
    %c1 = arith.constant 1 : index
    %c0_20 = arith.constant 0 : index
    %c0_21 = arith.constant 0 : index
    %36 = vector.load %arg2[%c1, %c0_20, %c0_21] : memref<2x8x4xf32, #tpu.memory_space<vmem>>, vector<1x8x4xf32>
    %37 = vector.shape_cast %36 : vector<1x8x4xf32> to vector<8x4xf32>
    %cst_22 = arith.constant dense<0.000000e+00> : vector<2x4xf32>
    %38 = tpu.matmul %35, %37, %cst_22 {dimension_numbers = #tpu.dot_dimension_numbers<[1], [0], [0], [1], [0, 0, 1, 1], [], []>} : vector<2x8xf32>, vector<8x4xf32>, vector<2x4xf32> -> vector<2x4xf32>
    %c1_23 = arith.constant 1 : index
    %c0_24 = arith.constant 0 : index
    %39 = vector.load %arg3[%c1_23, %c0_24] : memref<2x4xf32, #tpu.memory_space<vmem>>, vector<1x4xf32>
    %40 = vector.shape_cast %39 : vector<1x4xf32> to vector<4xf32>
    %41 = vector.shape_cast %40 : vector<4xf32> to vector<1x4xf32>
    %42 = vector.broadcast %41 : vector<1x4xf32> to vector<2x4xf32>
    %43 = arith.addf %38, %42 : vector<2x4xf32>
    %cst_25 = arith.constant 5.000000e-01 : f32
    %44 = vector.broadcast %cst_25 : f32 to vector<2x4xf32>
    %45 = arith.mulf %44, %43 : vector<2x4xf32>
    %cst_26 = arith.constant 0.707106769 : f32
    %46 = vector.broadcast %cst_26 : f32 to vector<2x4xf32>
    %47 = arith.mulf %43, %46 : vector<2x4xf32>
    %48 = math.erf %47 : vector<2x4xf32>
    %cst_27 = arith.constant 1.000000e+00 : f32
    %49 = vector.broadcast %cst_27 : f32 to vector<2x4xf32>
    %50 = arith.addf %49, %48 : vector<2x4xf32>
    %51 = arith.mulf %45, %50 : vector<2x4xf32>
    %c1_28 = arith.constant 1 : index
    %c0_29 = arith.constant 0 : index
    %c0_30 = arith.constant 0 : index
    %52 = vector.load %arg4[%c1_28, %c0_29, %c0_30] : memref<2x4x8xf32, #tpu.memory_space<vmem>>, vector<1x4x8xf32>
    %53 = vector.shape_cast %52 : vector<1x4x8xf32> to vector<4x8xf32>
    %cst_31 = arith.constant dense<0.000000e+00> : vector<2x8xf32>
    %54 = tpu.matmul %51, %53, %cst_31 {dimension_numbers = #tpu.dot_dimension_numbers<[1], [0], [0], [1], [0, 0, 1, 1], [], []>} : vector<2x4xf32>, vector<4x8xf32>, vector<2x8xf32> -> vector<2x8xf32>
    %c1_32 = arith.constant 1 : index
    %c0_33 = arith.constant 0 : index
    %55 = vector.load %arg5[%c1_32, %c0_33] : memref<2x8xf32, #tpu.memory_space<vmem>>, vector<1x8xf32>
    %56 = vector.shape_cast %55 : vector<1x8xf32> to vector<8xf32>
    %57 = vector.shape_cast %56 : vector<8xf32> to vector<1x8xf32>
    %58 = vector.broadcast %57 : vector<1x8xf32> to vector<2x8xf32>
    %59 = arith.addf %54, %58 : vector<2x8xf32>
    %60 = arith.negf %59 : vector<2x8xf32>
    %61 = math.exp %60 : vector<2x8xf32>
    %cst_34 = arith.constant 1.000000e+00 : f32
    %62 = vector.broadcast %cst_34 : f32 to vector<2x8xf32>
    %63 = arith.addf %62, %61 : vector<2x8xf32>
    %64 = arith.divf %62, %63 : vector<2x8xf32>
    %65 = arith.mulf %34, %64 : vector<2x8xf32>
    %66 = vector.shape_cast %65 : vector<2x8xf32> to vector<2x8x1xf32>
    %67 = vector.broadcast %66 : vector<2x8x1xf32> to vector<2x8x256xf32>
    %68 = arith.mulf %0, %67 : vector<2x8x256xf32>
    %c0_35 = arith.constant 0 : index
    %c0_36 = arith.constant 0 : index
    %c0_37 = arith.constant 0 : index
    %69 = vector.load %arg6[%c0_35, %c0_36, %c0_37] : memref<2x8x256xf32, #tpu.memory_space<vmem>>, vector<2x8x256xf32>
    tpu.vector_store %arg6[%c0_35, %c0_36, %c0_37], %68 {strides = array<i32>} : memref<2x8x256xf32, #tpu.memory_space<vmem>>, vector<2x8x256xf32>,
    return
  }
  func.func @transform_0(%arg0: i32) -> (i32, i32, i32) {
    %c0_i32 = arith.constant 0 : i32
    %c0_i32_0 = arith.constant 0 : i32
    %c0_i32_1 = arith.constant 0 : i32
    return %arg0, %c0_i32, %c0_i32_0 : i32, i32, i32
  }
  func.func @transform_1(%arg0: i32) -> (i32, i32, i32) {
    %c0_i32 = arith.constant 0 : i32
    %c0_i32_0 = arith.constant 0 : i32
    %c0_i32_1 = arith.constant 0 : i32
    %c0_i32_2 = arith.constant 0 : i32
    return %c0_i32, %c0_i32_0, %c0_i32_1 : i32, i32, i32
  }
  func.func @transform_2(%arg0: i32) -> (i32, i32) {
    %c0_i32 = arith.constant 0 : i32
    %c0_i32_0 = arith.constant 0 : i32
    %c0_i32_1 = arith.constant 0 : i32
    return %c0_i32, %c0_i32_0 : i32, i32
  }
  func.func @transform_3(%arg0: i32) -> (i32, i32, i32) {
    %c0_i32 = arith.constant 0 : i32
    %c0_i32_0 = arith.constant 0 : i32
    %c0_i32_1 = arith.constant 0 : i32
    %c0_i32_2 = arith.constant 0 : i32
    return %c0_i32, %c0_i32_0, %c0_i32_1 : i32, i32, i32
  }
  func.func @transform_4(%arg0: i32) -> (i32, i32) {
    %c0_i32 = arith.constant 0 : i32
    %c0_i32_0 = arith.constant 0 : i32
    %c0_i32_1 = arith.constant 0 : i32
    return %c0_i32, %c0_i32_0 : i32, i32
  }
  func.func @transform_5(%arg0: i32) -> (i32, i32, i32) {
    %c0_i32 = arith.constant 0 : i32
    %c0_i32_0 = arith.constant 0 : i32
    %c0_i32_1 = arith.constant 0 : i32
    return %arg0, %c0_i32, %c0_i32_0 : i32, i32, i32
  }
}

</mosaic_0001>

<bundles_post_ra>
// kernel: tpu_custom_call.1
= control target key start
LH: loop header
LB: loop body
LE: loop exit
PB: predicated region body
PF: predicated region fallthrough
CT: control target
= control target key end

     0   :  { %10 = vsyncpa [#allocation3], 0  ;;  %s719_s0 = inlined_call_operand.hbm [shape: f32[2,8,256], index: 0, kind: input, shape index: {}]   ;;  %s720_s1 = inlined_call_operand.vmem [shape: f32[2,8,4], index: 1, kind: input, shape index: {}]   ;;  %s721_s2 = inlined_call_operand.vmem [shape: f32[2,4], index: 2, kind: input, shape index: {}]   ;;  %s722_s3 = inlined_call_operand.vmem [shape: f32[2,4,8], index: 3, kind: input, shape index: {}]   ;;  %s723_s4 = inlined_call_operand.vmem [shape: f32[2,8], index: 4, kind: input, shape index: {}]   ;;  %s724_s5 = inlined_call_operand.hbm [shape: f32[2,8,256], index: 5, kind: output, shape index: {}]  }
   0x1   :  { %11 = vsyncpa [#allocation4], 0  ;;  %s595_s18 = smov [#allocation2]   ;;  %s547_s22 = scalar_lea.hbm %s719_s0, 512 }
   0x2   :  { %s17_s19 = sshll.u32 %s595_s18, 4  ;;  %p548_p0 = scmp.ne.s32.totalorder %s719_s0, %s547_s22  ;;  %s18_s19 = int_to_ptr.vmem [resolvable:$true] %s17_s19 }
   0x3   :  { %p551_p1 = scmp.lt.u32.totalorder %s547_s22, %s719_s0 }
   0x5   :  { %p553_p2 = pnand %p551_p1, %p548_p0 }
   0x7   :  { %556 = shalt.err (!%p553_p2)
}
   0x8   :  { %s557_s27 = scalar_lea.vmem %s18_s19, 512  ;;  %p562_p4 = scmp.lt.s32.totalorder %s18_s19, %s18_s19 }
   0x9   :  { %p558_p3 = scmp.ne.s32.totalorder %s18_s19, %s557_s27  ;;  %p563_p5 = scmp.lt.s32.totalorder %s557_s27, %s557_s27 }
   0xb   :  { %p564_p6 = por %p563_p5, %p562_p4 }
   0xd   :  { %p565_p7 = pnand %p564_p6, %p558_p3 }
   0xf   :  { %568 = shalt.err (!%p565_p7)
}
  0x10   :  { %s596_s28 = smov 256   ;;  %s597_s29 = smov 16  }
  0x11   :  { %23 = dma.hbm_to_vmem [thread:$0]  %s719_s0, 512, %s18_s19, [#allocation3], %s596_s28, %s596_s28, %s597_s29  }
  0x12   :  { %591 = dma.done.wait [#allocation3], 512  }
  0x13   :  { %592 = vsyncadd [#allocation3], 4294966784  ;;  %v647_v0 = vld [vmem:[#allocation2] sm:$0xff]  ;;  %v649_v1 = vld [vmem:[#allocation2 + $0x8] sm:$0xff]  ;;  %v598_v7 = vmov 0.0   ;;  %vm599_vm0 = vmmov 0   ;;  %v55_v8 = vlaneseq }
  0x14   :  { %v651_v2 = vld [vmem:[#allocation2 + $0x10] sm:$0xff]  ;;  %v39_v3 = vadd.f32 %v649_v1, %v647_v0  ;;  %v655_v4 = vld [vmem:[#allocation2 + $0x18] sm:$0xff]  ;;  %v47_v6 = vld [vmem:[%s720_s1] sm:$0xff]  ;;  %506 = vmatprep.subr.mxu0 %v598_v7  ;;  %508 = vmatprep.mubr.msk.f32.mxu0 %vm599_vm0, %v598_v7  ;;  %vm65_vm1 = vcmask 1041409   ;;  %vm67_vm2 = vcmask 64512   ;;  %vm155_vm3 = vcmask 1043456  }
  0x15   :  { %v42_v5 = vadd.f32 %v655_v4, %v651_v2  ;;  %507 = vmatpush3.msra.mxu0 %v47_v6  ;;  %511 = vmatprep.subr.mxu1 %v598_v7  ;;  %v56_v9 = vand.u32 127, %v55_v8  ;;  %v664_v10 = vshrl.u32 %v55_v8, 7  ;;  %v145_v19 = vld [vmem:[%s722_s3] sm:$0xf]  ;;  %vm151_vm4 = vcmask 31744   ;;  %v490_v44 = vld [vmem:[%s720_s1 + $0x8] sm:$0xff] }
  0x16   :  { %40 = vadd.xlane.f32.xlu0 %v39_v3  ;;  %513 = vmatprep.mubr.msk.f32.mxu1 %vm599_vm0, %v598_v7  ;;  %v484_v20 = vld [vmem:[%s721_s2] ss:$0 sm:$0xff]  ;;  %v600_v36 = vmov 0   ;;  %v493_v52 = vld [vmem:[%s722_s3 + $0x4] sm:$0xf] }
  0x17   :  { %516 = vmatprep.subr.mxu0 %v598_v7  ;;  %v59_v12 = vsub.s32 %v56_v9, %v664_v10  ;;  %512 = vmatpush3.msk.msra.mxu1 %vm155_vm3, %v145_v19  ;;  %v486_v29 = vld [vmem:[%s723_s4] ss:$0 sm:$0xff]  ;;  %v238_v37 = vsub.s32 0, %v664_v10  ;;  %v245_v40 = vsub.s32 1, %v664_v10  ;;  %v491_v53 = vld [vmem:[%s721_s2 + $0x1] ss:$0 sm:$0xff] }
  0x18   :  { %521 = vmatprep.subr.mxu1 %v598_v7  ;;  %533 = vset.pattern.permute.xlu0 %v600_v36  ;;  %v494_v62 = vld [vmem:[%s723_s4 + $0x1] ss:$0 sm:$0xff]  ;;  %s601_s2 = smov [#allocation5]  }
  0x19   :  { %534 = vset.pattern.permute.xlu1 %v600_v36  ;;  %s472_s3 = sshll.u32 %s601_s2, 4  ;;  %s473_s3 = int_to_ptr.vmem [resolvable:$true] %s472_s3 }
  0x1a   :  { %43 = vadd.xlane.f32.xlu0 %v42_v5  ;;  %s569_s4 = scalar_lea.vmem %s473_s3, 512  ;;  %p574_p9 = scmp.lt.s32.totalorder %s473_s3, %s473_s3 }
  0x1b   :  { %p570_p8 = scmp.ne.s32.totalorder %s473_s3, %s569_s4  ;;  %p575_p10 = scmp.lt.s32.totalorder %s569_s4, %s569_s4 }
  0x1d   :  { %p576_p11 = por %p575_p10, %p574_p9 }
  0x1f   :  { %p577_p12 = pnand %p576_p11, %p570_p8 }
  0xa3   :  { %v41_v11 = vpop.xlane.xlu0 %40 }
  0xa4   :  { %v45_v13 = vmul.f32 0.00390625, %v41_v11 }
  0xa6   :  { %v60_v16 = vrot.slane %v45_v13, %v59_v12 }
  0xa7   :  { %v44_v14 = vpop.xlane.xlu0 %43 }
  0xa8   :  { %v46_v15 = vmul.f32 0.00390625, %v44_v14 }
  0xaa   :  { %v64_v17 = vrot.slane %v46_v15, %v59_v12 }
  0xac   :  { %v66_v18 = vsel %vm65_vm1, %v64_v17, %v60_v16 }
  0xad   :  { %509 = vmatmul.mubr.msk.f32.vlgmr.msra.gmra.mrb[0].mxu0 %vm67_vm2, %v66_v18 }
  0xae   :  { %518 = vmatprep.mubr.msk.f32.mxu0 %vm599_vm0, %v598_v7  ;;  %517 = vmatpush3.msra.mxu0 %v490_v44 }
 0x180   :  { %v136_v21 = vpop.f32.mrb[0].mxu0 }
 0x181   :  { %v137_v22 = vadd.f32 %v484_v20, %v136_v21  ;;  %v510_v23 = vpop.f32.mrb[1].mxu0 }
 0x183   :  { %v141_v24 = vmul.f32 0.70710677, %v137_v22  ;;  %v140_v26 = vmul.f32 0.5, %v137_v22 }
 0x185   :  { %535 = verf.f32 %v141_v24 }
 0x18f   :  { %v536_v25 = vpop.eup %535 }
 0x190   :  { %v143_v27 = vadd.f32 1.0, %v536_v25 }
 0x192   :  { %v144_v28 = vmul.f32 %v143_v27, %v140_v26 }
 0x194   :  { %514 = vmatmul.mubr.msk.f32.vlgmr.msra.gmra.mrb[0].mxu1 %vm151_vm4, %v144_v28 }
 0x195   :  { %523 = vmatprep.mubr.msk.f32.mxu1 %vm599_vm0, %v598_v7  ;;  %522 = vmatpush3.msk.msra.mxu1 %vm155_vm3, %v493_v52 }
 0x267   :  { %v225_v30 = vpop.f32.mrb[0].mxu1 }
 0x268   :  { %v226_v31 = vadd.f32 %v486_v29, %v225_v30  ;;  %v515_v32 = vpop.f32.mrb[1].mxu1 }
 0x26a   :  { %v489_v33 = vmul.f32 -1.442695, %v226_v31 }
 0x26c   :  { %537 = vpow2.f32 %v489_v33 }
 0x276   :  { %v538_v34 = vpop.eup %537 }
 0x277   :  { %v232_v35 = vadd.f32 1.0, %v538_v34 }
 0x279   :  { %539 = vrcp.f32 %v232_v35 }
 0x283   :  { %v540_v38 = vpop.eup %539 }
 0x284   :  { %v239_v39 = vrot.slane %v540_v38, %v238_v37  ;;  %v246_v41 = vrot.slane %v540_v38, %v245_v40 }
 0x286   :  { %241 = vbcast.lane.b32.xlu1 %v239_v39, 256 }
 0x28a   :  { %248 = vbcast.lane.b32.xlu1 %v246_v41, 256 }
 0x2f8   :  { %v242_v42 = vpop.permute.xlu1 %241 }
 0x2f9   :  { %v252_v43 = vmul.f32 %v242_v42, %v45_v13 }
 0x2fb   :  { %264 = vperm.xlu0 %533, %v252_v43  }
 0x2fc   :  { %v249_v45 = vpop.permute.xlu1 %248 }
 0x2fd   :  { %v253_v46 = vmul.f32 %v249_v45, %v46_v15 }
 0x2ff   :  { %267 = vperm.xlu1 %534, %v253_v46  }
 0x37a   :  { %v265_v47 = vpop.permute.xlu0 %264 }
 0x37b   :  { %v272_v49 = vrot.slane %v265_v47, %v59_v12 }
 0x37e   :  { %v268_v48 = vpop.permute.xlu1 %267 }
 0x37f   :  { %v276_v50 = vrot.slane %v268_v48, %v59_v12 }
 0x381   :  { %v277_v51 = vsel %vm65_vm1, %v276_v50, %v272_v49 }
 0x382   :  { %519 = vmatmul.mubr.msk.f32.vlgmr.msra.gmra.mrb[2].mxu0 %vm67_vm2, %v277_v51 }
 0x455   :  { %v346_v54 = vpop.f32.mrb[2].mxu0 }
 0x456   :  { %v347_v55 = vadd.f32 %v491_v53, %v346_v54  ;;  %v520_v56 = vpop.f32.mrb[3].mxu0 }
 0x458   :  { %v351_v57 = vmul.f32 0.70710677, %v347_v55  ;;  %v350_v59 = vmul.f32 0.5, %v347_v55 }
 0x45a   :  { %541 = verf.f32 %v351_v57 }
 0x464   :  { %v542_v58 = vpop.eup %541 }
 0x465   :  { %v353_v60 = vadd.f32 1.0, %v542_v58 }
 0x467   :  { %v354_v61 = vmul.f32 %v353_v60, %v350_v59 }
 0x469   :  { %524 = vmatmul.mubr.msk.f32.vlgmr.msra.gmra.mrb[2].mxu1 %vm151_vm4, %v354_v61 }
 0x53c   :  { %v434_v63 = vpop.f32.mrb[2].mxu1 }
 0x53d   :  { %v435_v3 = vadd.f32 %v494_v62, %v434_v63  ;;  %v525_v5 = vpop.f32.mrb[3].mxu1 }
 0x53f   :  { %v497_v6 = vmul.f32 -1.442695, %v435_v3 }
 0x541   :  { %543 = vpow2.f32 %v497_v6 }
 0x54b   :  { %v544_v7 = vpop.eup %543 }
 0x54c   :  { %v441_v8 = vadd.f32 1.0, %v544_v7 }
 0x54e   :  { %545 = vrcp.f32 %v441_v8 }
 0x558   :  { %v546_v9 = vpop.eup %545 }
 0x559   :  { %v444_v10 = vmul.f32 %v546_v9, %v540_v38 }
 0x55b   :  { %v448_v11 = vrot.slane %v444_v10, %v238_v37  ;;  %v455_v12 = vrot.slane %v444_v10, %v245_v40 }
 0x55d   :  { %450 = vbcast.lane.b32.xlu1 %v448_v11, 256 }
 0x561   :  { %457 = vbcast.lane.b32.xlu1 %v455_v12, 256 }
 0x5cf   :  { %v451_v13 = vpop.permute.xlu1 %450 }
 0x5d0   :  { %v459_v14 = vmul.f32 %v451_v13, %v647_v0  ;;  %v460_v15 = vmul.f32 %v451_v13, %v649_v1 }
 0x5d2   :  { %463 = vst [vmem:[#allocation5] sm:$0xff] %v459_v14  ;;  %464 = vst [vmem:[#allocation5 + $0x8] sm:$0xff] %v460_v15 }
 0x5d3   :  { %v458_v16 = vpop.permute.xlu1 %457 }
 0x5d4   :  { %v461_v17 = vmul.f32 %v458_v16, %v651_v2  ;;  %v462_v18 = vmul.f32 %v458_v16, %v655_v4 }
 0x5d6   :  { %465 = vst [vmem:[#allocation5 + $0x10] sm:$0xff] %v461_v17  ;;  %466 = vst [vmem:[#allocation5 + $0x18] sm:$0xff] %v462_v18 }
 0x5d7   :  { %580 = shalt.err (!%p577_p12)
}
 0x5d8   :  { %s581_s23 = scalar_lea.hbm %s724_s5, 512 }
 0x5d9   :  { %p582_p13 = scmp.ne.s32.totalorder %s724_s5, %s581_s23  ;;  %p585_p0 = scmp.lt.u32.totalorder %s581_s23, %s724_s5 }
 0x5db   :  { %p587_p1 = pnand %p585_p0, %p582_p13 }
 0x5dd   :  { %590 = shalt.err (!%p587_p1)
}
 0x5de   :  { %478 = dma.vmem_to_hbm [thread:$0]  %s473_s3, 512, %s724_s5, [#allocation4], %s596_s28, %s596_s28, %s597_s29  }
 0x5df   :  { %593 = dma.done.wait [#allocation4], 512  }
 0x5e0   :  { %594 = vsyncadd [#allocation4], 4294966784 }
 0x5e1   :  { %482 = vsyncpa [#allocation3], 1 }
 0x5e2   :  { %483 = vsyncpa [#allocation4], 1 }

</bundles_post_ra>
